<compile_context>
chip_gen: v7x
topology: tpu7x:2x2x1
jax: 0.10.0
libtpu: 0.0.40
codegen_flags: <defaults>
</compile_context>

<pallas_src>
import functools

import jax
import jax.numpy as jnp
from jax.experimental import pallas as pl
from jax.experimental.pallas import tpu as pltpu


# ----------------------------------------------------------------------------
# Pallas kernel
# ----------------------------------------------------------------------------

def _layernorm_chw_kernel(x_ref, g_ref, b_ref, o_ref, *, eps, with_bias):
    """Channel LayerNorm on an NCHW-native tile.

    x_ref : (1, C, L) tile -- channels on the sublane axis, spatial on lanes
    g_ref : (1, C, 1) f32 scale (lane-broadcast)
    b_ref : (1, C, 1) f32 bias  (ignored for BiasFree)
    """
    x = x_ref[...].astype(jnp.float32)
    mu = jnp.mean(x, axis=1, keepdims=True)            # (1, 1, L)
    d = x - mu
    var = jnp.mean(d * d, axis=1, keepdims=True)       # two-pass biased variance
    inv = jax.lax.rsqrt(var + eps)                     # EUP rsqrt (free slot)
    g = g_ref[...]
    if with_bias:
        # WithBias_LayerNorm: (x - mu) / sqrt(var + eps) * w + b
        y = d * inv * g + b_ref[...]
    else:
        # BiasFree_LayerNorm: x / sqrt(var + eps) * w   (no mean subtraction)
        y = x * inv * g
    o_ref[...] = y.astype(o_ref.dtype)


# ----------------------------------------------------------------------------
# Tile sizing: ~2 MiB lane tiles, multiple of 128 (or full HW when HW <= 128),
# and at least 2 grid steps when B == 1 so both v7x TensorCores get work.
# ----------------------------------------------------------------------------

def _pick_lane_tile(hw, c, itemsize, batch, target_bytes):
    if hw <= 128:
        return hw                                   # full-dim lane block
    hw_padded = ((hw + 127) // 128) * 128
    t = max(128, (target_bytes // max(c * itemsize, 1)) // 128 * 128)
    t = min(t, hw_padded)
    if batch == 1:
        # keep >= 2 lane steps so dimension_semantics=("parallel","parallel")
        # can split work across both v7x TensorCores.
        t = min(t, max(128, (hw_padded // 2) // 128 * 128))
    return t


# ----------------------------------------------------------------------------
# Wrapper: NCHW -> (B, C, H*W) slab (free reshape) -> tiled pallas_call -> NCHW
# ----------------------------------------------------------------------------

@functools.partial(jax.jit,
                   static_argnames=('with_bias', 'eps', 'target_tile_bytes'))
def layer_norm_nchw(x, gamma, beta, *, with_bias=True, eps=1e-5,
                    target_tile_bytes=2 * 1024 * 1024):
    B, C, H, W = x.shape
    HW = H * W

    # Free, contiguous reshape — no transpose, no dtype change on the slab.
    x3 = x.reshape(B, C, HW)

    lane_t = _pick_lane_tile(HW, C, x.dtype.itemsize, B, target_tile_bytes)
    grid = (B, pl.cdiv(HW, lane_t))                  # ragged final lane block OK

    out = pl.pallas_call(
        functools.partial(_layernorm_chw_kernel, eps=eps, with_bias=with_bias),
        out_shape=jax.ShapeDtypeStruct((B, C, HW), x.dtype),
        grid=grid,
        in_specs=[
            pl.BlockSpec((1, C, lane_t), lambda b, l: (b, 0, l)),
            pl.BlockSpec((1, C, 1), lambda b, l: (0, 0, 0)),   # gamma (broadcast)
            pl.BlockSpec((1, C, 1), lambda b, l: (0, 0, 0)),   # beta  (broadcast)
        ],
        out_specs=pl.BlockSpec((1, C, lane_t), lambda b, l: (b, 0, l)),
        compiler_params=pltpu.CompilerParams(
            dimension_semantics=("parallel", "parallel"),   # independent tiles
            # ~2 MiB tiles double-buffered (in+out) need < 10 MiB; 32 MiB lifts
            # v5e's 16 MiB scoped default and leaves headroom on v7x (64 MiB).
            vmem_limit_bytes=32 * 1024 * 1024,
        ),
    )(x3,
      gamma.reshape(1, C, 1).astype(jnp.float32),
      beta.reshape(1, C, 1).astype(jnp.float32))

    return out.reshape(B, C, H, W)


class LayerNormPallas:
    """Mirrors the PyTorch `LayerNorm(dim, LayerNorm_type)` module forward."""

    def __init__(self, dim, layer_norm_type='WithBias'):
        self.dim = dim
        self.with_bias = (layer_norm_type != 'BiasFree')
        # Module init: weight=1, bias=0 (bias unused for BiasFree).
        self.weight = jnp.ones((dim,), jnp.float32)
        self.bias = jnp.zeros((dim,), jnp.float32)

    def __call__(self, x):
        return layer_norm_nchw(x, self.weight, self.bias,
                               with_bias=self.with_bias)


# ----------------------------------------------------------------------------
# Pure-JAX reference (matches the PyTorch forward exactly)
# ----------------------------------------------------------------------------

def _layer_norm_ref(x, gamma, beta, with_bias, eps=1e-5):
    xf = x.astype(jnp.float32)
    mu = jnp.mean(xf, axis=1, keepdims=True)
    var = jnp.mean((xf - mu) ** 2, axis=1, keepdims=True)
    g = gamma[None, :, None, None]
    if with_bias:
        return (xf - mu) / jnp.sqrt(var + eps) * g + beta[None, :, None, None]
    return xf / jnp.sqrt(var + eps) * g


# ----------------------------------------------------------------------------
# Main
# ----------------------------------------------------------------------------

if __name__ == "__main__":
    key = jax.random.PRNGKey(0)
    k1, k2, k3, k4, k5, k6, k7 = jax.random.split(key, 7)

    # ---- 1) WithBias, f32, lane-aligned spatial (HW = 256), mean offset ----
    B, C, H, W = 2, 32, 16, 16
    x = 3.0 + jax.random.normal(k1, (B, C, H, W), jnp.float32)
    ln_wb = LayerNormPallas(C, 'WithBias')
    ln_wb.weight = 1.0 + 0.1 * jax.random.normal(k2, (C,), jnp.float32)
    ln_wb.bias = 0.1 * jax.random.normal(k3, (C,), jnp.float32)

    y = jax.block_until_ready(ln_wb(x))
    y_ref = _layer_norm_ref(x, ln_wb.weight, ln_wb.bias, True)
    assert y.shape == x.shape and y.dtype == x.dtype
    assert bool(jnp.all(jnp.isfinite(y)))
    assert bool(jnp.max(jnp.abs(y.astype(jnp.float32) - y_ref)) < 1e-4)

    # ---- 2) BiasFree, bf16 DMA dtype, HW < 128 (full-dim lane block) ----
    B2, C2, H2, W2 = 2, 64, 9, 7
    x2 = jax.random.normal(k4, (B2, C2, H2, W2), jnp.bfloat16)
    ln_bf = LayerNormPallas(C2, 'BiasFree')
    ln_bf.weight = 1.0 + 0.1 * jax.random.normal(k5, (C2,), jnp.float32)

    y2 = jax.block_until_ready(ln_bf(x2))
    y2_ref = _layer_norm_ref(x2, ln_bf.weight, ln_bf.bias, False)
    assert y2.shape == x2.shape and y2.dtype == x2.dtype
    assert bool(jnp.all(jnp.isfinite(y2.astype(jnp.float32))))
    assert bool(jnp.max(jnp.abs(y2.astype(jnp.float32) - y2_ref)) < 5e-2)

    # ---- 3) WithBias, f32, B=1 with ragged lane blocks (HW = 400) ----
    B3, C3, H3, W3 = 1, 128, 20, 20
    x3 = jax.random.normal(k6, (B3, C3, H3, W3), jnp.float32)
    ln_wb2 = LayerNormPallas(C3, 'WithBias')
    ln_wb2.weight = 1.0 + 0.1 * jax.random.normal(k7, (C3,), jnp.float32)

    y3 = jax.block_until_ready(ln_wb2(x3))
    y3_ref = _layer_norm_ref(x3, ln_wb2.weight, ln_wb2.bias, True)
    assert y3.shape == x3.shape
    assert bool(jnp.all(jnp.isfinite(y3)))
    assert bool(jnp.max(jnp.abs(y3 - y3_ref)) < 1e-4)

    print("KERNEL_OK")
</pallas_src>

<mosaic_0001>
module attributes {stable_mosaic.version = 11 : i64} {
  func.func @_layernorm_chw_kernel(%arg0: i32, %arg1: i32, %arg2: memref<1x32x256xf32, #tpu.memory_space<vmem>>, %arg3: memref<1x32x1xf32, #tpu.memory_space<vmem>>, %arg4: memref<1x32x1xf32, #tpu.memory_space<vmem>>, %arg5: memref<1x32x256xf32, #tpu.memory_space<vmem>>) attributes {dimension_semantics = [#tpu.dimension_semantics<parallel>, #tpu.dimension_semantics<parallel>], iteration_bounds = array<i64: 2, 1>, scalar_prefetch = 0 : i64, scratch_operands = 0 : i64, tpu.core_type = #tpu.core_type<tc>, window_params = [{transform_indices = @transform_0, window_bounds = array<i64: 1, 32, 256>}, {pipeline_mode = #tpu.pipeline_mode<synchronous>, transform_indices = @transform_1, window_bounds = array<i64: 1, 32, 1>}, {pipeline_mode = #tpu.pipeline_mode<synchronous>, transform_indices = @transform_2, window_bounds = array<i64: 1, 32, 1>}, {transform_indices = @transform_3, window_bounds = array<i64: 1, 32, 256>}]} {
    %c0 = arith.constant 0 : index
    %c0_0 = arith.constant 0 : index
    %c0_1 = arith.constant 0 : index
    %0 = vector.load %arg2[%c0, %c0_0, %c0_1] : memref<1x32x256xf32, #tpu.memory_space<vmem>>, vector<1x32x256xf32>
    %cst = arith.constant dense<0.000000e+00> : vector<1x256xf32>
    %1 = vector.multi_reduction <add>, %0, %cst [1] : vector<1x32x256xf32> to vector<1x256xf32>
    %2 = vector.shape_cast %1 : vector<1x256xf32> to vector<1x1x256xf32>
    %cst_2 = arith.constant 3.200000e+01 : f32
    %3 = vector.broadcast %cst_2 : f32 to vector<1x1x256xf32>
    %4 = arith.divf %2, %3 : vector<1x1x256xf32>
    %5 = vector.broadcast %4 : vector<1x1x256xf32> to vector<1x32x256xf32>
    %6 = arith.subf %0, %5 : vector<1x32x256xf32>
    %7 = arith.mulf %6, %6 : vector<1x32x256xf32>
    %cst_3 = arith.constant dense<0.000000e+00> : vector<1x256xf32>
    %8 = vector.multi_reduction <add>, %7, %cst_3 [1] : vector<1x32x256xf32> to vector<1x256xf32>
    %9 = vector.shape_cast %8 : vector<1x256xf32> to vector<1x1x256xf32>
    %cst_4 = arith.constant 3.200000e+01 : f32
    %10 = vector.broadcast %cst_4 : f32 to vector<1x1x256xf32>
    %11 = arith.divf %9, %10 : vector<1x1x256xf32>
    %cst_5 = arith.constant 9.99999974E-6 : f32
    %12 = vector.broadcast %cst_5 : f32 to vector<1x1x256xf32>
    %13 = arith.addf %11, %12 : vector<1x1x256xf32>
    %14 = math.rsqrt %13 : vector<1x1x256xf32>
    %c0_6 = arith.constant 0 : index
    %c0_7 = arith.constant 0 : index
    %c0_8 = arith.constant 0 : index
    %15 = vector.load %arg3[%c0_6, %c0_7, %c0_8] : memref<1x32x1xf32, #tpu.memory_space<vmem>>, vector<1x32x1xf32>
    %16 = vector.broadcast %14 : vector<1x1x256xf32> to vector<1x32x256xf32>
    %17 = arith.mulf %6, %16 : vector<1x32x256xf32>
    %18 = vector.broadcast %15 : vector<1x32x1xf32> to vector<1x32x256xf32>
    %19 = arith.mulf %17, %18 : vector<1x32x256xf32>
    %c0_9 = arith.constant 0 : index
    %c0_10 = arith.constant 0 : index
    %c0_11 = arith.constant 0 : index
    %20 = vector.load %arg4[%c0_9, %c0_10, %c0_11] : memref<1x32x1xf32, #tpu.memory_space<vmem>>, vector<1x32x1xf32>
    %21 = vector.broadcast %20 : vector<1x32x1xf32> to vector<1x32x256xf32>
    %22 = arith.addf %19, %21 : vector<1x32x256xf32>
    %c0_12 = arith.constant 0 : index
    %c0_13 = arith.constant 0 : index
    %c0_14 = arith.constant 0 : index
    %23 = vector.load %arg5[%c0_12, %c0_13, %c0_14] : memref<1x32x256xf32, #tpu.memory_space<vmem>>, vector<1x32x256xf32>
    tpu.vector_store %arg5[%c0_12, %c0_13, %c0_14], %22 {strides = array<i32>} : memref<1x32x256xf32, #tpu.memory_space<vmem>>, vector<1x32x256xf32>,
    return
  }
  func.func @transform_0(%arg0: i32, %arg1: i32) -> (i32, i32, i32) {
    %c0_i32 = arith.constant 0 : i32
    %c0_i32_0 = arith.constant 0 : i32
    return %arg0, %c0_i32, %arg1 : i32, i32, i32
  }
  func.func @transform_1(%arg0: i32, %arg1: i32) -> (i32, i32, i32) {
    %c0_i32 = arith.constant 0 : i32
    %c0_i32_0 = arith.constant 0 : i32
    %c0_i32_1 = arith.constant 0 : i32
    %c0_i32_2 = arith.constant 0 : i32
    return %c0_i32, %c0_i32_0, %c0_i32_1 : i32, i32, i32
  }
  func.func @transform_2(%arg0: i32, %arg1: i32) -> (i32, i32, i32) {
    %c0_i32 = arith.constant 0 : i32
    %c0_i32_0 = arith.constant 0 : i32
    %c0_i32_1 = arith.constant 0 : i32
    %c0_i32_2 = arith.constant 0 : i32
    return %c0_i32, %c0_i32_0, %c0_i32_1 : i32, i32, i32
  }
  func.func @transform_3(%arg0: i32, %arg1: i32) -> (i32, i32, i32) {
    %c0_i32 = arith.constant 0 : i32
    %c0_i32_0 = arith.constant 0 : i32
    return %arg0, %c0_i32, %arg1 : i32, i32, i32
  }
}

</mosaic_0001>

<bundles_post_ra>
// kernel: layer_norm_nchw.1
= control target key start
LH: loop header
LB: loop body
LE: loop exit
PB: predicated region body
PF: predicated region fallthrough
CT: control target
= control target key end

     0   :  { %s535_s12 = smov 0   ;;  %s537_s13 = smov 0   ;;  %s599_s0 = inlined_call_operand.vmem [shape: f32[2,32,256], index: 0, kind: input, shape index: {}]   ;;  %s600_s1 = inlined_call_operand.vmem [shape: f32[1,32,1], index: 1, kind: input, shape index: {}]   ;;  %s601_s2 = inlined_call_operand.vmem [shape: f32[1,32,1], index: 2, kind: input, shape index: {}]   ;;  %s602_s3 = inlined_call_operand.vmem [shape: f32[2,32,256], index: 3, kind: output, shape index: {}]  }
   0x1   :  { %s539_s14 = smov 0  }
   0x2 LB: > { %s25_s15 = sadd.s32 1, %s508_s13  ;;  %p450_p0 = scmp.ge.s32.totalorder %s512_s14, 1  ;;  %s512_s14 = sphi %s539_s14, %s13_s14   ;;  %s508_s13 = sphi %s537_s13, %s604_s13   ;;  %s504_s12 = sphi %s535_s12, %s603_s12  }
   0x3   : > { %p27_p1 = scmp.ge.s32.totalorder %s25_s15, 2  ;;  %p158_p2 = scmp.lt.s32.totalorder %s512_s14, 3 }
   0x5   : > { %s606_s15 = smov (%p27_p1, %s25_s15), 0  ;;  %p159_p3 = pnand %p450_p0, %p158_p2 }
   0x6   : > { %v281_v0 = vld [vmem:[%s600_s1 + $0x10] sm:$0xff] (!%p159_p3)  ;;  %v279_v1 = vld [vmem:[%s600_s1] sm:$0xff] (!%p159_p3)  ;;  %v514_v2 = vmov (!%p159_p3), 0   ;;  %v282_v3 = vld [vmem:[%s600_s1 + $0x18] sm:$0xff] (!%p159_p3)  ;;  %p191_p4 = scmp.lt.s32.totalorder (!%p159_p3), %s504_s12, 1 }
   0x7   : > { %162 = sbr.rel (%p159_p3) target bundleno = 152 (0x98), region = 32  ;;  %485 = vset.pattern.permute.xlu1 (!%p159_p3), %v514_v2  ;;  %484 = vset.pattern.permute.xlu0 (!%p159_p3), %v514_v2  ;;  %v280_v4 = vld [vmem:[%s600_s1 + $0x8] sm:$0xff] (!%p159_p3)  ;;  %v319_v6 = vld [vmem:[%s601_s2] sm:$0xff] (!%p159_p3)  ;;  %v322_v7 = vld [vmem:[%s601_s2 + $0x18] sm:$0xff] (!%p159_p3) }
   0x8   : > { %303 = vperm.xlu1 (!%p159_p3), %485, %v281_v0   ;;  %293 = vperm.xlu0 (!%p159_p3), %484, %v279_v1   ;;  %v320_v5 = vld [vmem:[%s601_s2 + $0x8] sm:$0xff] (!%p159_p3)  ;;  %v321_v8 = vld [vmem:[%s601_s2 + $0x10] sm:$0xff] (!%p159_p3) }
   0xc   : > { %308 = vperm.xlu1 (!%p159_p3), %485, %v282_v3   ;;  %298 = vperm.xlu0 (!%p159_p3), %484, %v280_v4  }
   0xe   : > { %s608_s12 = smov (!%p191_p4, %s504_s12), 1 }
   0xf   : > { %s457_s5 = sshll.u32 %s608_s12, 6 }
  0x10   : > { %330 = vperm.xlu1 %485, %v320_v5   ;;  %325 = vperm.xlu0 %484, %v319_v6   ;;  %s198_s8 = scalar_lea.vmem %s599_s0, %s457_s5  ;;  %s208_s11 = scalar_lea.vmem %s602_s3, %s457_s5 }
  0x11   : > { %v210_v9 = vld [vmem:[%s198_s8] sm:$0xff]  ;;  %v212_v10 = vld [vmem:[%s198_s8 + $0x10] sm:$0xff]  ;;  %v211_v11 = vld [vmem:[%s198_s8 + $0x8] sm:$0xff] }
  0x12   : > { %v213_v12 = vld [vmem:[%s198_s8 + $0x18] sm:$0xff]  ;;  %v218_v13 = vadd.f32 %v212_v10, %v210_v9  ;;  %v214_v14 = vld [vmem:[%s198_s8 + $0x20] sm:$0xff]  ;;  %v215_v16 = vld [vmem:[%s198_s8 + $0x28] sm:$0xff] }
  0x13   : > { %v227_v15 = vadd.f32 %v213_v12, %v211_v11  ;;  %v216_v18 = vld [vmem:[%s198_s8 + $0x30] sm:$0xff]  ;;  %v217_v20 = vld [vmem:[%s198_s8 + $0x38] sm:$0xff] }
  0x14   : > { %340 = vperm.xlu1 %485, %v322_v7   ;;  %335 = vperm.xlu0 %484, %v321_v8   ;;  %v219_v17 = vadd.f32 %v218_v13, %v214_v14 }
  0x15   : > { %v228_v19 = vadd.f32 %v227_v15, %v215_v16 }
  0x16   : > { %v220_v21 = vadd.f32 %v219_v17, %v216_v18 }
  0x17   : > { %v229_v22 = vadd.f32 %v228_v19, %v217_v20 }
  0x18   : > { %v221_v23 = vrot.slane %v220_v21, 4 }
  0x19   : > { %v230_v24 = vrot.slane %v229_v22, 4 }
  0x1a   : > { %v222_v25 = vadd.f32 %v221_v23, %v220_v21 }
  0x1b   : > { %v231_v26 = vadd.f32 %v230_v24, %v229_v22 }
  0x1c   : > { %v223_v27 = vrot.slane %v222_v25, 2 }
  0x1d   : > { %v232_v28 = vrot.slane %v231_v26, 2 }
  0x1e   : > { %v224_v29 = vadd.f32 %v223_v27, %v222_v25 }
  0x1f   : > { %v233_v30 = vadd.f32 %v232_v28, %v231_v26 }
  0x20   : > { %v225_v31 = vrot.slane %v224_v29, 1 }
  0x21   : > { %v234_v32 = vrot.slane %v233_v30, 1 }
  0x22   : > { %v226_v33 = vadd.f32 %v225_v31, %v224_v29 }
  0x23   : > { %v235_v34 = vadd.f32 %v234_v32, %v233_v30 }
  0x24   : > { %v237_v35 = vmul.f32 0.03125, %v226_v33 }
  0x25   : > { %v238_v36 = vmul.f32 0.03125, %v235_v34 }
  0x26   : > { %v239_v37 = vsub.f32 %v210_v9, %v237_v35  ;;  %v241_v38 = vsub.f32 %v212_v10, %v237_v35  ;;  %v243_v41 = vsub.f32 %v214_v14, %v237_v35  ;;  %v245_v47 = vsub.f32 %v216_v18, %v237_v35 }
  0x27   : > { %v240_v39 = vsub.f32 %v211_v11, %v238_v36  ;;  %v242_v40 = vsub.f32 %v213_v12, %v238_v36  ;;  %v244_v44 = vsub.f32 %v215_v16, %v238_v36  ;;  %v246_v50 = vsub.f32 %v217_v20, %v238_v36 }
  0x28   : > { %v247_v42 = vmul.f32 %v239_v37, %v239_v37  ;;  %v249_v43 = vmul.f32 %v241_v38, %v241_v38  ;;  %v251_v48 = vmul.f32 %v243_v41, %v243_v41  ;;  %v253_v53 = vmul.f32 %v245_v47, %v245_v47 }
  0x29   : > { %v248_v45 = vmul.f32 %v240_v39, %v240_v39  ;;  %v250_v46 = vmul.f32 %v242_v40, %v242_v40  ;;  %v252_v51 = vmul.f32 %v244_v44, %v244_v44  ;;  %v254_v55 = vmul.f32 %v246_v50, %v246_v50 }
  0x2a   : > { %v255_v49 = vadd.f32 %v249_v43, %v247_v42 }
  0x2b   : > { %v264_v52 = vadd.f32 %v250_v46, %v248_v45 }
  0x2c   : > { %v256_v54 = vadd.f32 %v255_v49, %v251_v48 }
  0x2d   : > { %v265_v56 = vadd.f32 %v264_v52, %v252_v51 }
  0x2e   : > { %v257_v57 = vadd.f32 %v256_v54, %v253_v53 }
  0x2f   : > { %v266_v58 = vadd.f32 %v265_v56, %v254_v55 }
  0x30   : > { %v258_v59 = vrot.slane %v257_v57, 4 }
  0x31   : > { %v267_v60 = vrot.slane %v266_v58, 4 }
  0x32   : > { %v259_v61 = vadd.f32 %v258_v59, %v257_v57 }
  0x33   : > { %v268_v62 = vadd.f32 %v267_v60, %v266_v58 }
  0x34   : > { %v260_v63 = vrot.slane %v259_v61, 2 }
  0x35   : > { %v269_v0 = vrot.slane %v268_v62, 2 }
  0x36   : > { %v261_v1 = vadd.f32 %v260_v63, %v259_v61 }
  0x37   : > { %v270_v2 = vadd.f32 %v269_v0, %v268_v62 }
  0x38   : > { %v262_v3 = vrot.slane %v261_v1, 1 }
  0x39   : > { %v271_v4 = vrot.slane %v270_v2, 1 }
  0x3a   : > { %v263_v5 = vadd.f32 %v262_v3, %v261_v1 }
  0x3b   : > { %v272_v6 = vadd.f32 %v271_v4, %v270_v2 }
  0x3c   : > { %v273_v7 = vmul.f32 0.03125, %v263_v5 }
  0x3d   : > { %v274_v8 = vmul.f32 0.03125, %v272_v6 }
  0x3e   : > { %v275_v9 = vadd.f32 1e-05, %v273_v7 }
  0x3f   : > { %v276_v10 = vadd.f32 1e-05, %v274_v8 }
  0x40   : > { %486 = vrsqrt.f32 %v275_v9 }
  0x41   : > { %488 = vrsqrt.f32 %v276_v10 }
  0x4a   : > { %v487_v11 = vpop.eup %486 }
  0x4b   : > { %v489_v12 = vpop.eup %488  ;;  %v283_v15 = vmul.f32 %v487_v11, %v239_v37  ;;  %v285_v17 = vmul.f32 %v487_v11, %v241_v38  ;;  %v287_v21 = vmul.f32 %v487_v11, %v243_v41  ;;  %v289_v23 = vmul.f32 %v487_v11, %v245_v47 }
  0x4c   : > { %v284_v16 = vmul.f32 %v489_v12, %v240_v39  ;;  %v286_v18 = vmul.f32 %v489_v12, %v242_v40  ;;  %v288_v22 = vmul.f32 %v489_v12, %v244_v44  ;;  %v290_v24 = vmul.f32 %v489_v12, %v246_v50 }
  0x87   : > { %v304_v13 = vpop.permute.xlu1 %303  ;;  %v294_v14 = vpop.permute.xlu0 %293 }
  0x88   : > { %v311_v25 = vmul.f32 %v294_v14, %v283_v15  ;;  %v312_v26 = vmul.f32 %v294_v14, %v284_v16  ;;  %v315_v35 = vmul.f32 %v304_v13, %v287_v21  ;;  %v316_v36 = vmul.f32 %v304_v13, %v288_v22 }
  0x8b   : > { %v309_v19 = vpop.permute.xlu1 %308  ;;  %v299_v20 = vpop.permute.xlu0 %298 }
  0x8c   : > { %v313_v27 = vmul.f32 %v299_v20, %v285_v17  ;;  %v314_v28 = vmul.f32 %v299_v20, %v286_v18  ;;  %v317_v37 = vmul.f32 %v309_v19, %v289_v23  ;;  %v318_v38 = vmul.f32 %v309_v19, %v290_v24 }
  0x8f   : > { %v331_v29 = vpop.permute.xlu1 %330  ;;  %v326_v30 = vpop.permute.xlu0 %325 }
  0x90   : > { %v345_v31 = vadd.f32 %v331_v29, %v313_v27  ;;  %v346_v32 = vadd.f32 %v331_v29, %v314_v28  ;;  %v343_v33 = vadd.f32 %v326_v30, %v311_v25  ;;  %v344_v34 = vadd.f32 %v326_v30, %v312_v26 }
  0x92   : > { %353 = vst [vmem:[%s208_s11 + $0x10] sm:$0xff] %v345_v31  ;;  %354 = vst [vmem:[%s208_s11 + $0x18] sm:$0xff] %v346_v32 }
  0x93   : > { %351 = vst [vmem:[%s208_s11] sm:$0xff] %v343_v33  ;;  %352 = vst [vmem:[%s208_s11 + $0x8] sm:$0xff] %v344_v34  ;;  %v341_v39 = vpop.permute.xlu1 %340  ;;  %v336_v40 = vpop.permute.xlu0 %335 }
  0x94   : > { %v349_v41 = vadd.f32 %v341_v39, %v317_v37  ;;  %v350_v42 = vadd.f32 %v341_v39, %v318_v38  ;;  %v347_v43 = vadd.f32 %v336_v40, %v315_v35  ;;  %v348_v44 = vadd.f32 %v336_v40, %v316_v36 }
  0x96   : > { %357 = vst [vmem:[%s208_s11 + $0x30] sm:$0xff] %v349_v41  ;;  %358 = vst [vmem:[%s208_s11 + $0x38] sm:$0xff] %v350_v42 }
  0x97   : > { %355 = vst [vmem:[%s208_s11 + $0x20] sm:$0xff] %v347_v43  ;;  %356 = vst [vmem:[%s208_s11 + $0x28] sm:$0xff] %v348_v44 }
  0x98 PF: > { %s13_s14 = sadd.s32 1, %s512_s14   ;;  %s603_s12 = smov %s508_s13 }
  0x99   : > { %p10_p5 = scmp.ge.s32.totalorder %s13_s14, 4   ;;  %s604_s13 = smov %s606_s15 }
  0x9b   :  { %12 = sbr.rel (!%p10_p5) target bundleno = 2 (0x2), region = 62 }

</bundles_post_ra>
